<compile_context>
chip_gen: v7x
topology: tpu7x:2x2x1
jax: 0.10.0
libtpu: 0.0.40
codegen_flags: <defaults>
</compile_context>

<pallas_src>
import math

import jax
import jax.numpy as jnp
from jax.experimental import pallas as pl
from jax.experimental.pallas import tpu as pltpu

K_IN = 16                 # linear in_features
N_OUT = 32                # linear out_features
PACK = 8                  # original rows packed per lane-dense row
KP = K_IN * PACK          # 128 (packed input width  -> lane-dense loads)
NP = N_OUT * PACK         # 256 (packed output width -> unmasked stores)
TM_MAX = 4096             # packed-row tile (= 32768 original rows per step)
VMEM_LIMIT = 32 * 1024 * 1024


def _model_kernel(x_ref, w_ref, other_ref, o_ref):
    # x_ref:     [tm, 128]  native input dtype (cast in-kernel; VPU has slack)
    # w_ref:     [128, 256] f32 block-diagonal weight with v pre-folded in
    # other_ref: [1, 256]   f32 bias-like term, tiled 8x
    # o_ref:     [tm, 256]  output dtype
    y = jnp.dot(x_ref[...].astype(jnp.float32), w_ref[...],
                preferred_element_type=jnp.float32)
    o_ref[...] = (y + other_ref[...]).astype(o_ref.dtype)


def _round_up(a, b):
    return ((a + b - 1) // b) * b


def _choose_tile(rows, tm_max):
    """Packed-row tile: multiple of 16 (legal for f32/bf16 sublane tiling) or
    the full row extent; aims for >=2 grid steps so megacore can split."""
    if rows <= 16:
        return rows                       # single block, dim == full array dim
    tm = _round_up(pl.cdiv(rows, 2), 16)  # >=2 steps -> both TCs get work
    return min(tm, tm_max)


def _block_diag_weight(w32):
    """[16, 32] -> 8-way block-diagonal [128, 256] so packed rows matmul
    independently (the extra zero multiplies are free; kernel is DMA-bound)."""
    wp = jnp.zeros((KP, NP), dtype=jnp.float32)
    for p in range(PACK):
        wp = wp.at[p * K_IN:(p + 1) * K_IN, p * N_OUT:(p + 1) * N_OUT].set(w32)
    return wp


def make_model_forward(w, other, *, tm_max=TM_MAX):
    """Build a jitted forward(v, x).

    w:     [16, 32] linear weight (already transposed from torch's [32, 16]).
    other: [32] or [1, 32] (stand-in for the undefined self.other).
    v:     size-1 (scalar) or size-32 per-output-channel multiplier.
    x:     [..., 16]; returns [..., 32] in x.dtype.
    """
    w32 = jnp.asarray(w, jnp.float32)
    assert w32.shape == (K_IN, N_OUT)
    other32 = jnp.asarray(other, jnp.float32).reshape(1, N_OUT)

    wp_base = _block_diag_weight(w32)            # [128, 256], built once
    otherp = jnp.tile(other32, (1, PACK))        # [1, 256],  built once

    def forward(v, x):
        *lead, k = x.shape
        assert k == K_IN, f"last dim must be {K_IN}, got {k}"
        out_dtype = x.dtype
        m = math.prod(lead) if lead else 1
        x2d = x.reshape(m, K_IN)

        # Fold v into the weight columns: one tiny [128, 256] multiply replaces
        # an SMEM operand + per-output-element VPU multiply in the kernel.
        v32 = jnp.asarray(v, jnp.float32).reshape(-1)
        assert v32.size in (1, N_OUT), "v must be size-1 or size-32"
        v_cols = jnp.broadcast_to(v32, (N_OUT,))
        w_scaled = wp_base * jnp.tile(v_cols, PACK)[None, :]

        m_full = (m // PACK) * PACK
        rows = m_full // PACK
        tail = m - m_full

        out_main = None
        if rows > 0:
            # Zero-copy lane-dense packing: 8 rows of 16 -> one 128-wide row.
            xp_src = x2d if m_full == m else x2d[:m_full]
            xp = xp_src.reshape(rows, KP)

            tm = _choose_tile(rows, tm_max)
            grid = (pl.cdiv(rows, tm),)
            # Partial last block: OOB input rows read unspecified data; safe
            # because the matching output rows are dropped and no reduction
            # crosses rows.  (Do not reuse this pattern if a row reduction is
            # ever added.)
            outp = pl.pallas_call(
                _model_kernel,
                out_shape=jax.ShapeDtypeStruct((rows, NP), out_dtype),
                grid=grid,
                in_specs=[
                    pl.BlockSpec((tm, KP), lambda i: (i, 0)),   # x: streamed
                    pl.BlockSpec((KP, NP), lambda i: (0, 0)),   # w: resident
                    pl.BlockSpec((1, NP), lambda i: (0, 0)),    # other: resident
                ],
                out_specs=pl.BlockSpec((tm, NP), lambda i: (i, 0)),
                compiler_params=pltpu.CompilerParams(
                    dimension_semantics=("parallel",),          # megacore split
                    vmem_limit_bytes=VMEM_LIMIT),
            )(xp, w_scaled, otherp)
            out_main = outp.reshape(m_full, N_OUT)              # zero-copy split

        if tail:
            # <=7-row remainder (m % 8 != 0): tiny plain-JAX path so the hot
            # path never pads or slices full arrays.
            x_tail = x2d[m_full:].astype(jnp.float32)
            out_tail = (v_cols[None, :] * (x_tail @ w32) + other32).astype(out_dtype)
            out2d = out_tail if out_main is None else jnp.concatenate(
                [out_main, out_tail], axis=0)
        else:
            out2d = out_main

        return out2d.reshape(*lead, N_OUT)

    return jax.jit(forward)


if __name__ == "__main__":
    key = jax.random.PRNGKey(0)
    k_w, k_o, k_x, k_x2 = jax.random.split(key, 4)

    # torch Linear weight is [out_features, in_features]; we store its transpose.
    w_t = jax.random.normal(k_w, (N_OUT, K_IN), dtype=jnp.float32) * (1.0 / K_IN ** 0.5)
    w = w_t.T
    # TODO(synk): deterministic stand-in for the undefined self.other.
    other = jax.random.normal(k_o, (1, N_OUT), dtype=jnp.float32)
    v = jnp.ones((1,), dtype=jnp.float32)

    forward = make_model_forward(w, other)

    # Small shape consistent with the module (Linear over last dim = 16);
    # leading dims mirror the spec's (1, 3, 64, ...) input.  M = 192 -> fully
    # zero-copy path, 2 grid steps.
    x = jax.random.normal(k_x, (1, 3, 64, K_IN), dtype=jnp.float32)
    out = jax.block_until_ready(forward(v, x))
    ref = v * (x @ w) + other
    assert out.shape == (1, 3, 64, N_OUT)
    assert jnp.allclose(out, ref, atol=1e-4, rtol=1e-4)

    # M = 2100: not divisible by PACK nor by the tile -> exercises the Pallas
    # partial last block and the tiny tail path (no full-array pad/slice).
    x2 = jax.random.normal(k_x2, (3, 700, K_IN), dtype=jnp.float32)
    out2 = jax.block_until_ready(forward(v, x2))
    ref2 = v * (x2 @ w) + other
    assert out2.shape == (3, 700, N_OUT)
    assert jnp.allclose(out2, ref2, atol=1e-4, rtol=1e-4)

    # bf16 input streams in its native dtype (half the input DMA) and emits bf16.
    x3 = x.astype(jnp.bfloat16)
    out3 = jax.block_until_ready(forward(v, x3))
    assert out3.dtype == jnp.bfloat16
    ref3 = (v * (x3.astype(jnp.float32) @ w) + other).astype(jnp.bfloat16)
    assert jnp.allclose(out3.astype(jnp.float32), ref3.astype(jnp.float32),
                        atol=3e-2, rtol=3e-2)

    print("KERNEL_OK")
</pallas_src>

<mosaic_0001>
module attributes {stable_mosaic.version = 11 : i64} {
  func.func @_model_kernel(%arg0: i32, %arg1: memref<16x128xf32, #tpu.memory_space<vmem>>, %arg2: memref<128x256xf32, #tpu.memory_space<vmem>>, %arg3: memref<1x256xf32, #tpu.memory_space<vmem>>, %arg4: memref<16x256xf32, #tpu.memory_space<vmem>>) attributes {dimension_semantics = [#tpu.dimension_semantics<parallel>], iteration_bounds = array<i64: 2>, scalar_prefetch = 0 : i64, scratch_operands = 0 : i64, tpu.core_type = #tpu.core_type<tc>, window_params = [{transform_indices = @transform_0, window_bounds = array<i64: 16, 128>}, {pipeline_mode = #tpu.pipeline_mode<synchronous>, transform_indices = @transform_1, window_bounds = array<i64: 128, 256>}, {pipeline_mode = #tpu.pipeline_mode<synchronous>, transform_indices = @transform_2, window_bounds = array<i64: 1, 256>}, {transform_indices = @transform_3, window_bounds = array<i64: 16, 256>}]} {
    %c0 = arith.constant 0 : index
    %c0_0 = arith.constant 0 : index
    %0 = vector.load %arg1[%c0, %c0_0] : memref<16x128xf32, #tpu.memory_space<vmem>>, vector<16x128xf32>
    %c0_1 = arith.constant 0 : index
    %c0_2 = arith.constant 0 : index
    %1 = vector.load %arg2[%c0_1, %c0_2] : memref<128x256xf32, #tpu.memory_space<vmem>>, vector<128x256xf32>
    %cst = arith.constant dense<0.000000e+00> : vector<16x256xf32>
    %2 = tpu.matmul %0, %1, %cst {dimension_numbers = #tpu.dot_dimension_numbers<[1], [0], [0], [1], [0, 0, 1, 1], [], []>} : vector<16x128xf32>, vector<128x256xf32>, vector<16x256xf32> -> vector<16x256xf32>
    %c0_3 = arith.constant 0 : index
    %c0_4 = arith.constant 0 : index
    %3 = vector.load %arg3[%c0_3, %c0_4] : memref<1x256xf32, #tpu.memory_space<vmem>>, vector<1x256xf32>
    %4 = vector.broadcast %3 : vector<1x256xf32> to vector<16x256xf32>
    %5 = arith.addf %2, %4 : vector<16x256xf32>
    %c0_5 = arith.constant 0 : index
    %c0_6 = arith.constant 0 : index
    %6 = vector.load %arg4[%c0_5, %c0_6] : memref<16x256xf32, #tpu.memory_space<vmem>>, vector<16x256xf32>
    tpu.vector_store %arg4[%c0_5, %c0_6], %5 {strides = array<i32>} : memref<16x256xf32, #tpu.memory_space<vmem>>, vector<16x256xf32>,
    return
  }
  func.func @transform_0(%arg0: i32) -> (i32, i32) {
    %c0_i32 = arith.constant 0 : i32
    %c0_i32_0 = arith.constant 0 : i32
    return %arg0, %c0_i32 : i32, i32
  }
  func.func @transform_1(%arg0: i32) -> (i32, i32) {
    %c0_i32 = arith.constant 0 : i32
    %c0_i32_0 = arith.constant 0 : i32
    %c0_i32_1 = arith.constant 0 : i32
    return %c0_i32, %c0_i32_0 : i32, i32
  }
  func.func @transform_2(%arg0: i32) -> (i32, i32) {
    %c0_i32 = arith.constant 0 : i32
    %c0_i32_0 = arith.constant 0 : i32
    %c0_i32_1 = arith.constant 0 : i32
    return %c0_i32, %c0_i32_0 : i32, i32
  }
  func.func @transform_3(%arg0: i32) -> (i32, i32) {
    %c0_i32 = arith.constant 0 : i32
    %c0_i32_0 = arith.constant 0 : i32
    return %arg0, %c0_i32 : i32, i32
  }
}

</mosaic_0001>

<bundles_post_ra>
// kernel: forward.1
= control target key start
LH: loop header
LB: loop body
LE: loop exit
PB: predicated region body
PF: predicated region fallthrough
CT: control target
= control target key end

     0   :  { %s761_s12 = smov 0   ;;  %s763_s13 = smov 0   ;;  %s964_s0 = inlined_call_operand.vmem [shape: f32[24,128], index: 0, kind: input, shape index: {}]   ;;  %s965_s1 = inlined_call_operand.vmem [shape: f32[128,256], index: 1, kind: input, shape index: {}]   ;;  %s966_s2 = inlined_call_operand.vmem [shape: f32[1,256], index: 2, kind: input, shape index: {}]   ;;  %s967_s3 = inlined_call_operand.vmem [shape: f32[24,256], index: 3, kind: output, shape index: {}]  }
   0x1   :  { %s765_s14 = smov 0  }
   0x2 LB: > { %s774_s15 = sadd.s32 4294967295, %s706_s14   ;;  %s776_s16 = sadd.s32 1, %s706_s14   ;;  %s706_s14 = sphi %s765_s14, %s974_s14   ;;  %s702_s13 = sphi %s763_s13, %s973_s13   ;;  %s698_s12 = sphi %s761_s12, %s972_s12  }
   0x3   : > { %s85_s17 = ssub.s32 %s706_s14, %s776_s16  ;;  %s88_s18 = sadd.s32 1, %s702_s13 }
   0x4   : > { %p86_p0 = scmp.eq.s32.totalorder %s85_s17, 0  ;;  %p98_p1 = scmp.ne.s32.totalorder %s702_s13, %s698_s12 }
   0x5   : > { %p99_p2 = scmp.eq.s32.totalorder %s774_s15, 1  ;;  %p487_p3 = scmp.ge.s32.totalorder %s706_s14, 1 }
   0x6   : > { %s784_s19 = scalar_select %p86_p0, %s702_s13, %s88_s18  }
   0x7   : > { %p786_p4 = por %p99_p2, %p98_p1  ;;  %p146_p5 = scmp.lt.s32.totalorder %s706_s14, 3 }
   0x9   : > { %p147_p6 = pnand %p487_p3, %p146_p5 }
   0xa   : > { %v196_v0 = vld [vmem:[%s965_s1 + $0x8] sm:$0xff] (!%p147_p6)  ;;  %v198_v1 = vld [vmem:[%s965_s1 + $0x18] sm:$0xff] (!%p147_p6)  ;;  %v195_v2 = vld [vmem:[%s965_s1] sm:$0xff] (!%p147_p6)  ;;  %v740_v7 = vmov (!%p147_p6), 0.0   ;;  %s857_s23 = sshll.u32 (!%p147_p6), %s774_s15, 1  ;;  %v229_v51 = vlaneseq (!%p147_p6)  ;;  %s170_s29 = sand.u32 (!%p147_p6), 1, %s698_s12  }
   0xb   : > { %150 = sbr.rel (%p147_p6) target bundleno = 310 (0x136), region = 32  ;;  %v515_v3 = vpack.c.bf16 (!%p147_p6), %v198_v1, %v196_v0  ;;  %v197_v4 = vld [vmem:[%s965_s1 + $0x10] sm:$0xff] (!%p147_p6)  ;;  %v200_v5 = vld [vmem:[%s965_s1 + $0x28] sm:$0xff] (!%p147_p6)  ;;  %v202_v6 = vld [vmem:[%s965_s1 + $0x38] sm:$0xff] (!%p147_p6)  ;;  %303 = vmatprep.mubr.f32.mxu0 (!%p147_p6), %v740_v7  ;;  %309 = vmatprep.mubr.f32.mxu1 (!%p147_p6), %v740_v7  ;;  %p178_p7 = scmp.lt.s32.totalorder (!%p147_p6), %s857_s23, 2 }
   0xc   : > { %v517_v8 = vpack.c.bf16 (!%p147_p6), %v197_v4, %v195_v2  ;;  %v519_v9 = vpack.c.bf16 (!%p147_p6), %v202_v6, %v200_v5  ;;  %v199_v10 = vld [vmem:[%s965_s1 + $0x20] sm:$0xff] (!%p147_p6)  ;;  %v201_v11 = vld [vmem:[%s965_s1 + $0x30] sm:$0xff] (!%p147_p6)  ;;  %v204_v12 = vld [vmem:[%s965_s1 + $0x48] sm:$0xff] (!%p147_p6)  ;;  %v230_v52 = vshrl.u32 (!%p147_p6), %v229_v51, 7  ;;  %s488_s5 = sshll.u32 (!%p147_p6), %s170_s29, 5 }
   0xd   : > { %516 = vmatprep.subr.bf16.mxu0 (!%p147_p6), %v515_v3  ;;  %547 = vmatprep.subr.bf16.mxu1 (!%p147_p6), %v515_v3  ;;  %v206_v13 = vld [vmem:[%s965_s1 + $0x58] sm:$0xff] (!%p147_p6)  ;;  %v521_v14 = vpack.c.bf16 (!%p147_p6), %v201_v11, %v199_v10  ;;  %v203_v16 = vld [vmem:[%s965_s1 + $0x40] sm:$0xff] (!%p147_p6)  ;;  %v205_v17 = vld [vmem:[%s965_s1 + $0x50] sm:$0xff] (!%p147_p6)  ;;  %s898_s6 = scalar_lea.vmem (!%p147_p6), [#allocation2], %s488_s5  }
   0xe   : > { %518 = vmatpush1.bf16.msra.mxu0 (!%p147_p6), %v517_v8  ;;  %555 = vmatpush1.bf16.msra.mxu1 (!%p147_p6), %v517_v8  ;;  %v523_v15 = vpack.c.bf16 (!%p147_p6), %v206_v13, %v204_v12  ;;  %v208_v18 = vld [vmem:[%s965_s1 + $0x68] sm:$0xff] (!%p147_p6)  ;;  %v210_v19 = vld [vmem:[%s965_s1 + $0x78] sm:$0xff] (!%p147_p6)  ;;  %v525_v20 = vpack.c.bf16 (!%p147_p6), %v205_v17, %v203_v16  ;;  %v207_v22 = vld [vmem:[%s965_s1 + $0x60] sm:$0xff] (!%p147_p6)  ;;  %v231_v53 = vsub.s32 (!%p147_p6), 0, %v230_v52  ;;  %v235_v55 = vsub.s32 (!%p147_p6), 1, %v230_v52 }
   0xf   : > { %520 = vmatprep.subr.bf16.mxu0 (!%p147_p6), %v519_v9  ;;  %548 = vmatprep.subr.bf16.mxu1 (!%p147_p6), %v519_v9  ;;  %v527_v21 = vpack.c.bf16 (!%p147_p6), %v210_v19, %v208_v18  ;;  %v209_v23 = vld [vmem:[%s965_s1 + $0x70] sm:$0xff] (!%p147_p6)  ;;  %v212_v24 = vld [vmem:[%s965_s1 + $0x88] sm:$0xff] (!%p147_p6)  ;;  %v214_v25 = vld [vmem:[%s965_s1 + $0x98] sm:$0xff] (!%p147_p6) }
  0x10   : > { %v529_v26 = vpack.c.bf16 (!%p147_p6), %v209_v23, %v207_v22  ;;  %v531_v27 = vpack.c.bf16 (!%p147_p6), %v214_v25, %v212_v24  ;;  %v211_v28 = vld [vmem:[%s965_s1 + $0x80] sm:$0xff] (!%p147_p6)  ;;  %v213_v29 = vld [vmem:[%s965_s1 + $0x90] sm:$0xff] (!%p147_p6)  ;;  %v216_v30 = vld [vmem:[%s965_s1 + $0xa8] sm:$0xff] (!%p147_p6) }
  0x11   : > { %v218_v31 = vld [vmem:[%s965_s1 + $0xb8] sm:$0xff] (!%p147_p6)  ;;  %v533_v32 = vpack.c.bf16 (!%p147_p6), %v213_v29, %v211_v28  ;;  %v215_v34 = vld [vmem:[%s965_s1 + $0xa0] sm:$0xff] (!%p147_p6)  ;;  %v217_v35 = vld [vmem:[%s965_s1 + $0xb0] sm:$0xff] (!%p147_p6) }
  0x12   : > { %522 = vmatpush1.bf16.msra.mxu0 %v521_v14  ;;  %556 = vmatpush1.bf16.msra.mxu1 %v521_v14  ;;  %v535_v33 = vpack.c.bf16 %v218_v31, %v216_v30  ;;  %v220_v36 = vld [vmem:[%s965_s1 + $0xc8] sm:$0xff]  ;;  %v222_v37 = vld [vmem:[%s965_s1 + $0xd8] sm:$0xff]  ;;  %v537_v38 = vpack.c.bf16 %v217_v35, %v215_v34  ;;  %v219_v40 = vld [vmem:[%s965_s1 + $0xc0] sm:$0xff]  ;;  %s179_s17 = scalar_select %p178_p7, %s857_s23, 2 }
  0x13   : > { %524 = vmatprep.subr.bf16.mxu0 %v523_v15  ;;  %549 = vmatprep.subr.bf16.mxu1 %v523_v15  ;;  %v539_v39 = vpack.c.bf16 %v222_v37, %v220_v36  ;;  %v221_v41 = vld [vmem:[%s965_s1 + $0xd0] sm:$0xff]  ;;  %v224_v42 = vld [vmem:[%s965_s1 + $0xe8] sm:$0xff]  ;;  %v226_v43 = vld [vmem:[%s965_s1 + $0xf8] sm:$0xff]  ;;  %s328_s12 = ssub.s32 (%p786_p4), 3, %s857_s23  ;;  %s512_s7 = sshll.u32 (%p786_p4), %s774_s15, 5 }
  0x14   : > { %v541_v44 = vpack.c.bf16 %v221_v41, %v219_v40  ;;  %v543_v45 = vpack.c.bf16 %v226_v43, %v224_v42  ;;  %v223_v46 = vld [vmem:[%s965_s1 + $0xe0] sm:$0xff]  ;;  %v225_v47 = vld [vmem:[%s965_s1 + $0xf0] sm:$0xff]  ;;  %s490_s25 = sshll.u32 %s179_s17, 3  ;;  %p329_p8 = scmp.lt.s32.totalorder (%p786_p4), %s328_s12, 2 }
  0x15   : > { %v545_v48 = vpack.c.bf16 %v225_v47, %v223_v46  ;;  %s181_s28 = scalar_lea.vmem %s964_s0, %s490_s25  ;;  %v227_v54 = vld [vmem:[%s966_s2] sm:$0x3]  ;;  %s911_s10 = scalar_lea.vmem (%p786_p4), %s967_s3, %s512_s7  }
  0x16   : > { %526 = vmatpush1.bf16.msra.mxu0 %v525_v20  ;;  %557 = vmatpush1.bf16.msra.mxu1 %v525_v20  ;;  %v193_v49 = vld [vmem:[%s181_s28] sm:$0xff]  ;;  %v194_v50 = vld [vmem:[%s181_s28 + $0x8] sm:$0xff]  ;;  %v232_v56 = vrot.slane %v227_v54, %v231_v53  ;;  %v236_v57 = vrot.slane %v227_v54, %v235_v55 }
  0x17   : > { %528 = vmatprep.subr.bf16.mxu0 %v527_v21  ;;  %550 = vmatprep.subr.bf16.mxu1 %v527_v21 }
  0x1a   : > { %530 = vmatpush1.bf16.msra.mxu0 %v529_v26  ;;  %558 = vmatpush1.bf16.msra.mxu1 %v529_v26 }
  0x1b   : > { %532 = vmatprep.subr.bf16.mxu0 %v531_v27  ;;  %551 = vmatprep.subr.bf16.mxu1 %v531_v27 }
  0x1e   : > { %534 = vmatpush1.bf16.msra.mxu0 %v533_v32  ;;  %559 = vmatpush1.bf16.msra.mxu1 %v533_v32 }
  0x1f   : > { %536 = vmatprep.subr.bf16.mxu0 %v535_v33  ;;  %552 = vmatprep.subr.bf16.mxu1 %v535_v33 }
  0x22   : > { %538 = vmatpush1.bf16.msra.mxu0 %v537_v38  ;;  %560 = vmatpush1.bf16.msra.mxu1 %v537_v38 }
  0x23   : > { %540 = vmatprep.subr.bf16.mxu0 %v539_v39  ;;  %553 = vmatprep.subr.bf16.mxu1 %v539_v39 }
  0x26   : > { %542 = vmatpush1.bf16.msra.mxu0 %v541_v44  ;;  %561 = vmatpush1.bf16.msra.mxu1 %v541_v44 }
  0x27   : > { %544 = vmatprep.subr.bf16.mxu0 %v543_v45  ;;  %554 = vmatprep.subr.bf16.mxu1 %v543_v45 }
  0x2a   : > { %546 = vmatpush1.bf16.msra.mxu0 %v545_v48  ;;  %562 = vmatpush1.bf16.msra.mxu1 %v545_v48 }
  0x2d   : > { %304 = vmatmul.mubr.f32.vlgmr.msra.gmra.mrb[0].mxu0 %v193_v49  ;;  %310 = vmatmul.mubr.f32.vlgmr.msra.gmra.mrb[0].mxu1 %v194_v50 }
  0xfe   : > { %326 = sbr.rel (!%p786_p4) target bundleno = 310 (0x136), region = 36 }
 0x100   : > { %v305_v58 = vpop.f32.mrb[0].mxu0  ;;  %v311_v59 = vpop.f32.mrb[0].mxu1 }
 0x101   : > { %v306_v60 = vadd.f32 %v305_v58, %v232_v56  ;;  %v312_v61 = vadd.f32 %v311_v59, %v232_v56  ;;  %v307_v62 = vpop.f32.mrb[1].mxu0  ;;  %v313_v63 = vpop.f32.mrb[1].mxu1 }
 0x102   : > { %v308_v0 = vadd.f32 %v307_v62, %v236_v57  ;;  %v314_v1 = vadd.f32 %v313_v63, %v236_v57 }
 0x103   : > { %316 = vst [vmem:[%s898_s6] sm:$0xff] %v306_v60  ;;  %318 = vst [vmem:[%s898_s6 + $0x10] sm:$0xff] %v312_v61 }
 0x104   : > { %317 = vst [vmem:[%s898_s6 + $0x8] sm:$0xff] %v308_v0  ;;  %319 = vst [vmem:[%s898_s6 + $0x18] sm:$0xff] %v314_v1 }
 0x105   : > { %s976_s12 = smov (!%p329_p8, %s328_s12), 2 }
 0x106   : > { %s510_s11 = sshll.u32 %s976_s12, 8 }
 0x107   : > { %p498_p9 = scmp.eq.s32.totalorder %s510_s11, 0 }
 0x108   : > { %s917_s14 = sshrl.u32 (!%p498_p9), %s976_s12, 1 }
 0x109   : > { %339 = sbr.rel (%p498_p9) target bundleno = 310 (0x136), region = 40  ;;  %p499_p10 = scmp.le.s32.totalorder (!%p498_p9), %s917_s14, 0 }
 0x110   : > { %440 = sbr.rel (%p499_p10) target bundleno = 289 (0x121), region = 88  ;;  %s969_s15 = smov (!%p499_p10), %s911_s10 }
 0x111   : > { %s970_s20 = smov (!%p499_p10), %s898_s6  ;;  %s926_s23 = smov (!%p499_p10), 0  }
 0x112   : > { %s720_s17 = smov (!%p499_p10), 0  }
 0x117 LB: >> { %v352_v2 = vld [vmem:[%s714_s20] sm:$0xff]  ;;  %v354_v3 = vld [vmem:[%s714_s20 + $0x10] sm:$0xff]  ;;  %v356_v4 = vld [vmem:[%s714_s20 + $0x8] sm:$0xff]  ;;  %s360_s18 = sadd.s32 1, %s718_s23  ;;  %s346_s17 = sadd.s32 1, %s722_s17   ;;  %s722_s17 = sphi %s720_s17, %s346_s17   ;;  %s718_s23 = sphi %s926_s23, %s971_s23   ;;  %s714_s20 = sphi %s970_s20, %s365_s20   ;;  %s710_s15 = sphi %s969_s15, %s366_s15  }
 0x118   : >> { %353 = vst [vmem:[%s710_s15] sm:$0xff] %v352_v2  ;;  %355 = vst [vmem:[%s710_s15 + $0x10] sm:$0xff] %v354_v3  ;;  %v358_v5 = vld [vmem:[%s714_s20 + $0x18] sm:$0xff]  ;;  %p361_p11 = scmp.ge.s32.totalorder %s360_s18, %s917_s14  ;;  %p345_p12 = scmp.ge.s32.totalorder %s346_s17, %s917_s14 }
 0x119   : >> { %357 = vst [vmem:[%s710_s15 + $0x8] sm:$0xff] %v356_v4  ;;  %359 = vst [vmem:[%s710_s15 + $0x18] sm:$0xff] %v358_v5 }
 0x11a   : >> { %s978_s18 = smov (%p361_p11, %s360_s18), 0  ;;  %348 = sbr.rel (!%p345_p12) target bundleno = 279 (0x117), region = 94 }
 0x11b   : >> { %s500_s21 = sshll.u32 %s978_s18, 5  ;;  %s971_s23 = smov %s978_s18 }
 0x11c   : >> { %s365_s20 = scalar_lea.vmem %s898_s6, %s500_s21 [#allocation2]   ;;  %s366_s15 = scalar_lea.vmem %s911_s10, %s500_s21  }
 0x121 PF: > { %s942_s22 = sand.u32 1, %s976_s12   ;;  %s513_s24 = sshll.u32 %s917_s14, 5 }
 0x122   : > { %s946_s25 = scalar_lea.vmem %s898_s6, %s513_s24 [#allocation2]   ;;  %s373_s26 = scalar_lea.vmem %s911_s10, %s513_s24  }
 0x123   : > { %p505_p13 = scmp.le.s32.totalorder %s942_s22, 0 }
 0x124   : > { %s724_s27 = smov (!%p505_p13), %s373_s26   ;;  %s728_s28 = smov (!%p505_p13), %s946_s25  }
 0x125   : > { %454 = sbr.rel (%p505_p13) target bundleno = 310 (0x136), region = 99  ;;  %s732_s29 = smov (!%p505_p13), 0  }
 0x126   : > { %s736_s30 = smov (!%p505_p13), 0  }
 0x12c LB: >> { %v383_v6 = vld [vmem:[%s730_s28] sm:$0xff]  ;;  %v385_v7 = vld [vmem:[%s730_s28 + $0x8] sm:$0xff]  ;;  %s387_s4 = sadd.s32 1, %s734_s29  ;;  %s377_s30 = sadd.s32 1, %s738_s30   ;;  %s738_s30 = sphi %s736_s30, %s377_s30   ;;  %s734_s29 = sphi %s732_s29, %s733_s29   ;;  %s730_s28 = sphi %s728_s28, %s392_s28   ;;  %s726_s27 = sphi %s724_s27, %s393_s27  }
 0x12d   : >> { %384 = vst [vmem:[%s726_s27] sm:$0xff] %v383_v6  ;;  %386 = vst [vmem:[%s726_s27 + $0x8] sm:$0xff] %v385_v7  ;;  %p388_p0 = scmp.ge.s32.totalorder %s387_s4, %s942_s22  ;;  %p376_p1 = scmp.ge.s32.totalorder %s377_s30, %s942_s22 }
 0x12f   : >> { %s980_s4 = smov (%p388_p0, %s387_s4), 0  ;;  %379 = sbr.rel (!%p376_p1) target bundleno = 300 (0x12c), region = 105 }
 0x130   : >> { %s506_s5 = sshll.u32 %s980_s4, 4  ;;  %s733_s29 = smov %s980_s4  }
 0x131   : >> { %s392_s28 = scalar_lea.vmem %s946_s25, %s506_s5 [#allocation2]   ;;  %s393_s27 = scalar_lea.vmem %s373_s26, %s506_s5  }
 0x136 PF: > { %p10_p2 = scmp.ge.s32.totalorder %s776_s16, 4   ;;  %s972_s12 = smov %s702_s13 }
 0x137   : > { %s973_s13 = smov %s784_s19  ;;  %s974_s14 = smov %s776_s16 }
 0x138   :  { %12 = sbr.rel (!%p10_p2) target bundleno = 2 (0x2), region = 116 }

</bundles_post_ra>
